<compile_context>
chip_gen: v7x
topology: tpu7x:2x2x1
jax: 0.10.0
libtpu: 0.0.40
codegen_flags: <defaults>
</compile_context>

<pallas_src>
import functools

import jax
import jax.numpy as jnp
from jax import lax
from jax.experimental import pallas as pl
from jax.experimental.pallas import tpu as pltpu


def _round_up(x, m):
    return ((x + m - 1) // m) * m


def _token_goal_emb_kernel(tok_ref, wrec_ref, brec_ref, wff_ref, bff_ref,
                           gamma_ref, beta_ref, out_ref, *,
                           min_token, clamp_max, hidden, goal_dim):
    tn, seq = tok_ref.shape
    kp = wrec_ref.shape[0]

    # Shift tokens so they directly address the one-hot lane block [hidden, hidden+V).
    tok = jnp.clip(tok_ref[...] - min_token, 0, clamp_max) + hidden       # (TN, S) int32

    # Hoist all weight loads / iota / broadcasts out of the unrolled loop.
    wrec = wrec_ref[...]                                                  # (KP, KP) bf16/f32
    brec = brec_ref[...]                                                  # (1, KP)  f32
    lane = lax.broadcasted_iota(jnp.int32, (tn, kp), 1)                   # (TN, KP)

    # hp carries the hidden state in lanes [0, H); lanes >= H stay exactly 0
    # because wrec columns >= H and brec lanes >= H are zero and tanh(0) == 0.
    hp = jnp.zeros((tn, kp), jnp.float32)
    for t in range(seq):            # S is small & static -> fully unrolled
        one_hot = (lane == tok[:, t:t + 1]).astype(jnp.float32)           # (TN, KP)
        x = (hp + one_hot).astype(wrec.dtype)
        # Fused RNN step: one MXU matmul = emb(tok) @ W_ih + h @ W_hh (+ biases).
        hp = jnp.tanh(jnp.dot(x, wrec, preferred_element_type=jnp.float32) + brec)

    # goal_ff, zero-padded to GP output lanes so the final store is lane-dense.
    y = jnp.dot(hp, wff_ref[...], preferred_element_type=jnp.float32) + bff_ref[...]

    # goal_norm: LayerNorm over the true G features (eps=1e-5, biased variance).
    yg = y[:, :goal_dim]
    mean = jnp.mean(yg, axis=-1, keepdims=True)
    var = jnp.mean((yg - mean) ** 2, axis=-1, keepdims=True)
    # gamma/beta are zero beyond lane G, so padded lanes store exact zeros.
    out_ref[...] = (y - mean) * lax.rsqrt(var + 1e-5) * gamma_ref[...] + beta_ref[...]


def token_goal_emb_forward(goals, params, *, min_token, max_token, goal_emb_dim,
                           zero_embedding=False, tile_n=256,
                           matmul_dtype=jnp.bfloat16):
    """goals: int array (B, L, GL, GD). Returns float32 (B, L, goal_emb_dim)."""
    B, L, GL, GD = goals.shape
    if zero_embedding:
        return jnp.zeros((B, L, goal_emb_dim), jnp.float32)

    N, S, G = B * L, GL * GD, goal_emb_dim
    V = max_token - min_token + 1                       # vocab size (= self._max_token)
    E, H = params["wih"].shape

    KP = _round_up(V + H, 128)      # fused [hidden | one_hot] MXU contraction width
    GP = _round_up(G, 128)          # lane-dense output width

    f32 = jnp.float32
    # Fold the embedding table into W_ih and stack with W_hh -> one matmul per step.
    emb_w = jnp.dot(params["table"].astype(f32), params["wih"].astype(f32))   # (V, H)
    w_rec = jnp.zeros((KP, KP), f32)
    w_rec = w_rec.at[:H, :H].set(params["whh"].astype(f32))
    w_rec = w_rec.at[H:H + V, :H].set(emb_w)
    w_rec = w_rec.astype(matmul_dtype)
    b_rec = jnp.zeros((1, KP), f32).at[:, :H].set(
        params["bih"].astype(f32) + params["bhh"].astype(f32))

    # Final Linear + LayerNorm params, zero-padded to GP output lanes.
    w_ff = jnp.zeros((KP, GP), f32).at[:H, :G].set(params["wff"].astype(f32))
    b_ff = jnp.zeros((1, GP), f32).at[:, :G].set(params["bff"].astype(f32))
    gamma = jnp.zeros((1, GP), f32).at[:, :G].set(params["gamma"].astype(f32))
    beta = jnp.zeros((1, GP), f32).at[:, :G].set(params["beta"].astype(f32))

    # Large row tiles to amortize per-grid-step overhead, but keep the grid >= 2
    # so both v7x TensorCores get a share of the "parallel" axis.
    tile = max(8, min(tile_n, _round_up(pl.cdiv(N, 2), 8)))
    tile = _round_up(tile, 8)
    n_pad = _round_up(N, tile)

    tok = goals.reshape(N, S).astype(jnp.int32)
    if n_pad != N:
        tok = jnp.pad(tok, ((0, n_pad - N), (0, 0)))

    kernel = functools.partial(_token_goal_emb_kernel, min_token=min_token,
                               clamp_max=V - 1, hidden=H, goal_dim=G)

    def _const(shape):
        # Constant index_map: weight tile is DMA'd into VMEM once, never re-fetched.
        return pl.BlockSpec(shape, lambda i: (0,) * len(shape))

    out = pl.pallas_call(
        kernel,
        out_shape=jax.ShapeDtypeStruct((n_pad, GP), jnp.float32),
        grid_spec=pltpu.PrefetchScalarGridSpec(
            num_scalar_prefetch=0,
            grid=(n_pad // tile,),
            in_specs=[
                pl.BlockSpec((tile, S), lambda i: (i, 0)),       # token rows tile
                _const(w_rec.shape), _const(b_rec.shape),
                _const(w_ff.shape), _const(b_ff.shape),
                _const(gamma.shape), _const(beta.shape),
            ],
            out_specs=pl.BlockSpec((tile, GP), lambda i: (i, 0)),
        ),
        compiler_params=pltpu.CompilerParams(
            dimension_semantics=("parallel",)),
    )(tok, w_rec, b_rec, w_ff, b_ff, gamma, beta)

    return out[:N, :G].reshape(B, L, G)


def ref_forward(goals, params, *, min_token, max_token, goal_emb_dim):
    """Pure-JAX f32 reference mirroring the PyTorch forward."""
    B, L, GL, GD = goals.shape
    V = max_token - min_token + 1
    tok = jnp.clip(goals.reshape(B * L, GL * GD).astype(jnp.int32) - min_token,
                   0, V - 1)
    emb = params["table"][tok]                                   # (N, S, E)
    H = params["whh"].shape[0]
    h = jnp.zeros((B * L, H), jnp.float32)
    for t in range(GL * GD):
        h = jnp.tanh(emb[:, t, :] @ params["wih"] + params["bih"]
                     + h @ params["whh"] + params["bhh"])
    y = h @ params["wff"] + params["bff"]
    mean = y.mean(-1, keepdims=True)
    var = ((y - mean) ** 2).mean(-1, keepdims=True)
    y = (y - mean) / jnp.sqrt(var + 1e-5)
    y = y * params["gamma"] + params["beta"]
    return y.reshape(B, L, goal_emb_dim)


if __name__ == "__main__":
    # Small config consistent with the module's __init__.
    B, L = 2, 8
    GL, GD = 3, 2                 # goal_length, goal_dim -> sequence S = 6
    min_token, max_token = -8, 8  # vocab V = 17
    embedding_dim = 16
    hidden_size = 64
    goal_emb_dim = 32

    V = max_token - min_token + 1

    key = jax.random.PRNGKey(0)
    keys = jax.random.split(key, 9)
    scale = 0.1
    params = {
        "table": scale * jax.random.normal(keys[0], (V, embedding_dim), jnp.float32),
        "wih":   scale * jax.random.normal(keys[1], (embedding_dim, hidden_size), jnp.float32),
        "whh":   scale * jax.random.normal(keys[2], (hidden_size, hidden_size), jnp.float32),
        "bih":   scale * jax.random.normal(keys[3], (1, hidden_size), jnp.float32),
        "bhh":   scale * jax.random.normal(keys[4], (1, hidden_size), jnp.float32),
        "wff":   scale * jax.random.normal(keys[5], (hidden_size, goal_emb_dim), jnp.float32),
        "bff":   scale * jax.random.normal(keys[6], (1, goal_emb_dim), jnp.float32),
        "gamma": 1.0 + scale * jax.random.normal(keys[7], (1, goal_emb_dim), jnp.float32),
        "beta":  scale * jax.random.normal(keys[8], (1, goal_emb_dim), jnp.float32),
    }

    goals = jax.random.randint(jax.random.PRNGKey(1), (B, L, GL, GD),
                               minval=min_token, maxval=max_token + 1,
                               dtype=jnp.int32)
    # Pin the out-of-range-token behaviour (clipped to the last valid embedding row).
    goals = goals.at[0, 0, 0, 0].set(max_token + 3)
    goals = goals.at[0, 0, 1, 1].set(min_token - 5)

    ref = ref_forward(goals, params, min_token=min_token, max_token=max_token,
                      goal_emb_dim=goal_emb_dim)

    # f32 MXU path: must match the pure-JAX reference almost exactly.
    out_f32 = token_goal_emb_forward(goals, params, min_token=min_token,
                                     max_token=max_token, goal_emb_dim=goal_emb_dim,
                                     matmul_dtype=jnp.float32)
    out_f32 = jax.block_until_ready(out_f32)
    assert out_f32.shape == (B, L, goal_emb_dim)
    assert jnp.allclose(out_f32, ref, atol=1e-3, rtol=1e-3), "f32 kernel mismatch vs reference"

    # Default bf16-recurrence path (MXU-native); looser tolerance because bf16
    # input rounding is amplified by the final LayerNorm's 1/std scaling.
    out = token_goal_emb_forward(goals, params, min_token=min_token,
                                 max_token=max_token, goal_emb_dim=goal_emb_dim)
    out = jax.block_until_ready(out)
    assert out.shape == (B, L, goal_emb_dim)
    assert jnp.allclose(out, ref, atol=2e-2, rtol=2e-2), "bf16 kernel mismatch vs reference"

    print("KERNEL_OK")
</pallas_src>

<mosaic_0001>
module attributes {stable_mosaic.version = 11 : i64} {
  func.func @_token_goal_emb_kernel(%arg0: i32, %arg1: memref<8x6xi32, #tpu.memory_space<vmem>>, %arg2: memref<128x128xf32, #tpu.memory_space<vmem>>, %arg3: memref<1x128xf32, #tpu.memory_space<vmem>>, %arg4: memref<128x128xf32, #tpu.memory_space<vmem>>, %arg5: memref<1x128xf32, #tpu.memory_space<vmem>>, %arg6: memref<1x128xf32, #tpu.memory_space<vmem>>, %arg7: memref<1x128xf32, #tpu.memory_space<vmem>>, %arg8: memref<8x128xf32, #tpu.memory_space<vmem>>) attributes {dimension_semantics = [#tpu.dimension_semantics<parallel>], iteration_bounds = array<i64: 2>, scalar_prefetch = 0 : i64, scratch_operands = 0 : i64, tpu.core_type = #tpu.core_type<tc>, window_params = [{transform_indices = @transform_0, window_bounds = array<i64: 8, 6>}, {pipeline_mode = #tpu.pipeline_mode<synchronous>, transform_indices = @transform_1, window_bounds = array<i64: 128, 128>}, {pipeline_mode = #tpu.pipeline_mode<synchronous>, transform_indices = @transform_2, window_bounds = array<i64: 1, 128>}, {pipeline_mode = #tpu.pipeline_mode<synchronous>, transform_indices = @transform_3, window_bounds = array<i64: 128, 128>}, {pipeline_mode = #tpu.pipeline_mode<synchronous>, transform_indices = @transform_4, window_bounds = array<i64: 1, 128>}, {pipeline_mode = #tpu.pipeline_mode<synchronous>, transform_indices = @transform_5, window_bounds = array<i64: 1, 128>}, {pipeline_mode = #tpu.pipeline_mode<synchronous>, transform_indices = @transform_6, window_bounds = array<i64: 1, 128>}, {transform_indices = @transform_7, window_bounds = array<i64: 8, 128>}]} {
    %c0 = arith.constant 0 : index
    %c0_0 = arith.constant 0 : index
    %0 = vector.load %arg1[%c0, %c0_0] : memref<8x6xi32, #tpu.memory_space<vmem>>, vector<8x6xi32>
    %c-8_i32 = arith.constant -8 : i32
    %1 = vector.broadcast %c-8_i32 : i32 to vector<8x6xi32>
    %2 = arith.subi %0, %1 : vector<8x6xi32>
    %c0_i32 = arith.constant 0 : i32
    %c16_i32 = arith.constant 16 : i32
    %3 = vector.broadcast %c0_i32 : i32 to vector<8x6xi32>
    %4 = arith.maxsi %3, %2 : vector<8x6xi32>
    %5 = vector.broadcast %c16_i32 : i32 to vector<8x6xi32>
    %6 = arith.minsi %5, %4 : vector<8x6xi32>
    %c64_i32 = arith.constant 64 : i32
    %7 = vector.broadcast %c64_i32 : i32 to vector<8x6xi32>
    %8 = arith.addi %6, %7 : vector<8x6xi32>
    %c0_1 = arith.constant 0 : index
    %c0_2 = arith.constant 0 : index
    %9 = vector.load %arg2[%c0_1, %c0_2] : memref<128x128xf32, #tpu.memory_space<vmem>>, vector<128x128xf32>
    %c0_3 = arith.constant 0 : index
    %c0_4 = arith.constant 0 : index
    %10 = vector.load %arg3[%c0_3, %c0_4] : memref<1x128xf32, #tpu.memory_space<vmem>>, vector<1x128xf32>
    %11 = tpu.iota {dimensions = array<i32: 1>} : vector<8x128xi32>
    %cst = arith.constant 0.000000e+00 : f32
    %12 = vector.broadcast %cst : f32 to vector<8x128xf32>
    %13 = vector.extract_strided_slice %8 {offsets = [0, 0], sizes = [8, 1], strides = [1, 1]} : vector<8x6xi32> to vector<8x1xi32>
    %14 = vector.broadcast %13 : vector<8x1xi32> to vector<8x128xi32>
    %15 = arith.cmpi eq, %11, %14 : vector<8x128xi32>
    %16 = arith.extui %15 : vector<8x128xi1> to vector<8x128xi32>
    %17 = arith.sitofp %16 : vector<8x128xi32> to vector<8x128xf32>
    %18 = arith.addf %12, %17 : vector<8x128xf32>
    %cst_5 = arith.constant dense<0.000000e+00> : vector<8x128xf32>
    %19 = tpu.matmul %18, %9, %cst_5 {dimension_numbers = #tpu.dot_dimension_numbers<[1], [0], [0], [1], [0, 0, 1, 1], [], []>} : vector<8x128xf32>, vector<128x128xf32>, vector<8x128xf32> -> vector<8x128xf32>
    %20 = vector.broadcast %10 : vector<1x128xf32> to vector<8x128xf32>
    %21 = arith.addf %19, %20 : vector<8x128xf32>
    %22 = math.tanh %21 : vector<8x128xf32>
    %23 = vector.extract_strided_slice %8 {offsets = [0, 1], sizes = [8, 1], strides = [1, 1]} : vector<8x6xi32> to vector<8x1xi32>
    %24 = vector.broadcast %23 : vector<8x1xi32> to vector<8x128xi32>
    %25 = arith.cmpi eq, %11, %24 : vector<8x128xi32>
    %26 = arith.extui %25 : vector<8x128xi1> to vector<8x128xi32>
    %27 = arith.sitofp %26 : vector<8x128xi32> to vector<8x128xf32>
    %28 = arith.addf %22, %27 : vector<8x128xf32>
    %cst_6 = arith.constant dense<0.000000e+00> : vector<8x128xf32>
    %29 = tpu.matmul %28, %9, %cst_6 {dimension_numbers = #tpu.dot_dimension_numbers<[1], [0], [0], [1], [0, 0, 1, 1], [], []>} : vector<8x128xf32>, vector<128x128xf32>, vector<8x128xf32> -> vector<8x128xf32>
    %30 = vector.broadcast %10 : vector<1x128xf32> to vector<8x128xf32>
    %31 = arith.addf %29, %30 : vector<8x128xf32>
    %32 = math.tanh %31 : vector<8x128xf32>
    %33 = vector.extract_strided_slice %8 {offsets = [0, 2], sizes = [8, 1], strides = [1, 1]} : vector<8x6xi32> to vector<8x1xi32>
    %34 = vector.broadcast %33 : vector<8x1xi32> to vector<8x128xi32>
    %35 = arith.cmpi eq, %11, %34 : vector<8x128xi32>
    %36 = arith.extui %35 : vector<8x128xi1> to vector<8x128xi32>
    %37 = arith.sitofp %36 : vector<8x128xi32> to vector<8x128xf32>
    %38 = arith.addf %32, %37 : vector<8x128xf32>
    %cst_7 = arith.constant dense<0.000000e+00> : vector<8x128xf32>
    %39 = tpu.matmul %38, %9, %cst_7 {dimension_numbers = #tpu.dot_dimension_numbers<[1], [0], [0], [1], [0, 0, 1, 1], [], []>} : vector<8x128xf32>, vector<128x128xf32>, vector<8x128xf32> -> vector<8x128xf32>
    %40 = vector.broadcast %10 : vector<1x128xf32> to vector<8x128xf32>
    %41 = arith.addf %39, %40 : vector<8x128xf32>
    %42 = math.tanh %41 : vector<8x128xf32>
    %43 = vector.extract_strided_slice %8 {offsets = [0, 3], sizes = [8, 1], strides = [1, 1]} : vector<8x6xi32> to vector<8x1xi32>
    %44 = vector.broadcast %43 : vector<8x1xi32> to vector<8x128xi32>
    %45 = arith.cmpi eq, %11, %44 : vector<8x128xi32>
    %46 = arith.extui %45 : vector<8x128xi1> to vector<8x128xi32>
    %47 = arith.sitofp %46 : vector<8x128xi32> to vector<8x128xf32>
    %48 = arith.addf %42, %47 : vector<8x128xf32>
    %cst_8 = arith.constant dense<0.000000e+00> : vector<8x128xf32>
    %49 = tpu.matmul %48, %9, %cst_8 {dimension_numbers = #tpu.dot_dimension_numbers<[1], [0], [0], [1], [0, 0, 1, 1], [], []>} : vector<8x128xf32>, vector<128x128xf32>, vector<8x128xf32> -> vector<8x128xf32>
    %50 = vector.broadcast %10 : vector<1x128xf32> to vector<8x128xf32>
    %51 = arith.addf %49, %50 : vector<8x128xf32>
    %52 = math.tanh %51 : vector<8x128xf32>
    %53 = vector.extract_strided_slice %8 {offsets = [0, 4], sizes = [8, 1], strides = [1, 1]} : vector<8x6xi32> to vector<8x1xi32>
    %54 = vector.broadcast %53 : vector<8x1xi32> to vector<8x128xi32>
    %55 = arith.cmpi eq, %11, %54 : vector<8x128xi32>
    %56 = arith.extui %55 : vector<8x128xi1> to vector<8x128xi32>
    %57 = arith.sitofp %56 : vector<8x128xi32> to vector<8x128xf32>
    %58 = arith.addf %52, %57 : vector<8x128xf32>
    %cst_9 = arith.constant dense<0.000000e+00> : vector<8x128xf32>
    %59 = tpu.matmul %58, %9, %cst_9 {dimension_numbers = #tpu.dot_dimension_numbers<[1], [0], [0], [1], [0, 0, 1, 1], [], []>} : vector<8x128xf32>, vector<128x128xf32>, vector<8x128xf32> -> vector<8x128xf32>
    %60 = vector.broadcast %10 : vector<1x128xf32> to vector<8x128xf32>
    %61 = arith.addf %59, %60 : vector<8x128xf32>
    %62 = math.tanh %61 : vector<8x128xf32>
    %63 = vector.extract_strided_slice %8 {offsets = [0, 5], sizes = [8, 1], strides = [1, 1]} : vector<8x6xi32> to vector<8x1xi32>
    %64 = vector.broadcast %63 : vector<8x1xi32> to vector<8x128xi32>
    %65 = arith.cmpi eq, %11, %64 : vector<8x128xi32>
    %66 = arith.extui %65 : vector<8x128xi1> to vector<8x128xi32>
    %67 = arith.sitofp %66 : vector<8x128xi32> to vector<8x128xf32>
    %68 = arith.addf %62, %67 : vector<8x128xf32>
    %cst_10 = arith.constant dense<0.000000e+00> : vector<8x128xf32>
    %69 = tpu.matmul %68, %9, %cst_10 {dimension_numbers = #tpu.dot_dimension_numbers<[1], [0], [0], [1], [0, 0, 1, 1], [], []>} : vector<8x128xf32>, vector<128x128xf32>, vector<8x128xf32> -> vector<8x128xf32>
    %70 = vector.broadcast %10 : vector<1x128xf32> to vector<8x128xf32>
    %71 = arith.addf %69, %70 : vector<8x128xf32>
    %72 = math.tanh %71 : vector<8x128xf32>
    %c0_11 = arith.constant 0 : index
    %c0_12 = arith.constant 0 : index
    %73 = vector.load %arg4[%c0_11, %c0_12] : memref<128x128xf32, #tpu.memory_space<vmem>>, vector<128x128xf32>
    %cst_13 = arith.constant dense<0.000000e+00> : vector<8x128xf32>
    %74 = tpu.matmul %72, %73, %cst_13 {dimension_numbers = #tpu.dot_dimension_numbers<[1], [0], [0], [1], [0, 0, 1, 1], [], []>} : vector<8x128xf32>, vector<128x128xf32>, vector<8x128xf32> -> vector<8x128xf32>
    %c0_14 = arith.constant 0 : index
    %c0_15 = arith.constant 0 : index
    %75 = vector.load %arg5[%c0_14, %c0_15] : memref<1x128xf32, #tpu.memory_space<vmem>>, vector<1x128xf32>
    %76 = vector.broadcast %75 : vector<1x128xf32> to vector<8x128xf32>
    %77 = arith.addf %74, %76 : vector<8x128xf32>
    %78 = vector.extract_strided_slice %77 {offsets = [0, 0], sizes = [8, 32], strides = [1, 1]} : vector<8x128xf32> to vector<8x32xf32>
    %cst_16 = arith.constant dense<0.000000e+00> : vector<8xf32>
    %79 = vector.multi_reduction <add>, %78, %cst_16 [1] : vector<8x32xf32> to vector<8xf32>
    %80 = vector.shape_cast %79 : vector<8xf32> to vector<8x1xf32>
    %cst_17 = arith.constant 3.200000e+01 : f32
    %81 = vector.broadcast %cst_17 : f32 to vector<8x1xf32>
    %82 = arith.divf %80, %81 : vector<8x1xf32>
    %83 = vector.broadcast %82 : vector<8x1xf32> to vector<8x32xf32>
    %84 = arith.subf %78, %83 : vector<8x32xf32>
    %85 = arith.mulf %84, %84 : vector<8x32xf32>
    %cst_18 = arith.constant dense<0.000000e+00> : vector<8xf32>
    %86 = vector.multi_reduction <add>, %85, %cst_18 [1] : vector<8x32xf32> to vector<8xf32>
    %87 = vector.shape_cast %86 : vector<8xf32> to vector<8x1xf32>
    %cst_19 = arith.constant 3.200000e+01 : f32
    %88 = vector.broadcast %cst_19 : f32 to vector<8x1xf32>
    %89 = arith.divf %87, %88 : vector<8x1xf32>
    %90 = vector.broadcast %82 : vector<8x1xf32> to vector<8x128xf32>
    %91 = arith.subf %77, %90 : vector<8x128xf32>
    %cst_20 = arith.constant 9.99999974E-6 : f32
    %92 = vector.broadcast %cst_20 : f32 to vector<8x1xf32>
    %93 = arith.addf %89, %92 : vector<8x1xf32>
    %94 = math.rsqrt %93 : vector<8x1xf32>
    %95 = vector.broadcast %94 : vector<8x1xf32> to vector<8x128xf32>
    %96 = arith.mulf %91, %95 : vector<8x128xf32>
    %c0_21 = arith.constant 0 : index
    %c0_22 = arith.constant 0 : index
    %97 = vector.load %arg6[%c0_21, %c0_22] : memref<1x128xf32, #tpu.memory_space<vmem>>, vector<1x128xf32>
    %98 = vector.broadcast %97 : vector<1x128xf32> to vector<8x128xf32>
    %99 = arith.mulf %96, %98 : vector<8x128xf32>
    %c0_23 = arith.constant 0 : index
    %c0_24 = arith.constant 0 : index
    %100 = vector.load %arg7[%c0_23, %c0_24] : memref<1x128xf32, #tpu.memory_space<vmem>>, vector<1x128xf32>
    %101 = vector.broadcast %100 : vector<1x128xf32> to vector<8x128xf32>
    %102 = arith.addf %99, %101 : vector<8x128xf32>
    %c0_25 = arith.constant 0 : index
    %c0_26 = arith.constant 0 : index
    %103 = vector.load %arg8[%c0_25, %c0_26] : memref<8x128xf32, #tpu.memory_space<vmem>>, vector<8x128xf32>
    tpu.vector_store %arg8[%c0_25, %c0_26], %102 {strides = array<i32>} : memref<8x128xf32, #tpu.memory_space<vmem>>, vector<8x128xf32>,
    return
  }
  func.func @transform_0(%arg0: i32) -> (i32, i32) {
    %c0_i32 = arith.constant 0 : i32
    %c0_i32_0 = arith.constant 0 : i32
    return %arg0, %c0_i32 : i32, i32
  }
  func.func @transform_1(%arg0: i32) -> (i32, i32) {
    %c0_i32 = arith.constant 0 : i32
    %c0_i32_0 = arith.constant 0 : i32
    %c0_i32_1 = arith.constant 0 : i32
    return %c0_i32, %c0_i32_0 : i32, i32
  }
  func.func @transform_2(%arg0: i32) -> (i32, i32) {
    %c0_i32 = arith.constant 0 : i32
    %c0_i32_0 = arith.constant 0 : i32
    %c0_i32_1 = arith.constant 0 : i32
    return %c0_i32, %c0_i32_0 : i32, i32
  }
  func.func @transform_3(%arg0: i32) -> (i32, i32) {
    %c0_i32 = arith.constant 0 : i32
    %c0_i32_0 = arith.constant 0 : i32
    %c0_i32_1 = arith.constant 0 : i32
    return %c0_i32, %c0_i32_0 : i32, i32
  }
  func.func @transform_4(%arg0: i32) -> (i32, i32) {
    %c0_i32 = arith.constant 0 : i32
    %c0_i32_0 = arith.constant 0 : i32
    %c0_i32_1 = arith.constant 0 : i32
    return %c0_i32, %c0_i32_0 : i32, i32
  }
  func.func @transform_5(%arg0: i32) -> (i32, i32) {
    %c0_i32 = arith.constant 0 : i32
    %c0_i32_0 = arith.constant 0 : i32
    %c0_i32_1 = arith.constant 0 : i32
    return %c0_i32, %c0_i32_0 : i32, i32
  }
  func.func @transform_6(%arg0: i32) -> (i32, i32) {
    %c0_i32 = arith.constant 0 : i32
    %c0_i32_0 = arith.constant 0 : i32
    %c0_i32_1 = arith.constant 0 : i32
    return %c0_i32, %c0_i32_0 : i32, i32
  }
  func.func @transform_7(%arg0: i32) -> (i32, i32) {
    %c0_i32 = arith.constant 0 : i32
    %c0_i32_0 = arith.constant 0 : i32
    return %arg0, %c0_i32 : i32, i32
  }
}

</mosaic_0001>

<bundles_post_ra>
// kernel: tpu_custom_call.1
= control target key start
LH: loop header
LB: loop body
LE: loop exit
PB: predicated region body
PF: predicated region fallthrough
CT: control target
= control target key end

     0   :  { %12 = vsyncpa [#allocation3], 0  ;;  %s2204_s0 = inlined_call_operand.vmem [shape: s32[16,6], index: 0, kind: input, shape index: {}]   ;;  %s2205_s1 = inlined_call_operand.hbm [shape: f32[128,128], index: 1, kind: input, shape index: {}]   ;;  %s2206_s2 = inlined_call_operand.vmem [shape: f32[1,128], index: 2, kind: input, shape index: {}]   ;;  %s2207_s3 = inlined_call_operand.hbm [shape: f32[128,128], index: 3, kind: input, shape index: {}]   ;;  %s2208_s4 = inlined_call_operand.vmem [shape: f32[1,128], index: 4, kind: input, shape index: {}]   ;;  %s2209_s5 = inlined_call_operand.vmem [shape: f32[1,128], index: 5, kind: input, shape index: {}]   ;;  %s2210_s6 = inlined_call_operand.vmem [shape: f32[1,128], index: 6, kind: input, shape index: {}]   ;;  %s2211_s7 = inlined_call_operand.hbm [shape: f32[16,128], index: 7, kind: output, shape index: {}]  }
   0x1   :  { %13 = vsyncpa [#allocation6], 0 }
   0x2   :  { %14 = vsyncpa [#allocation4], 0 }
   0x3   :  { %16 = vsyncpa [#allocation4 + $0x1], 0  ;;  %s1857_s24 = smov 0   ;;  %s1859_s25 = smov 0  }
   0x4   :  { %s1861_s26 = smov 0   ;;  %s1863_s27 = smov 0  }
   0x5 LB: > { %s1878_s28 = sadd.s32 4294967295, %s1800_s27   ;;  %s1024_s29 = sadd.s32 4294967294, %s1800_s27   ;;  %s1800_s27 = sphi %s1863_s27, %s2231_s27   ;;  %s1796_s26 = sphi %s1861_s26, %s2230_s26   ;;  %s1792_s25 = sphi %s1859_s25, %s2229_s25   ;;  %s1788_s24 = sphi %s1857_s24, %s2228_s24  }
   0x6   : > { %s1882_s30 = sadd.s32 1, %s1800_s27   ;;  %s181_s8 = sadd.s32 1, %s1796_s26 }
   0x7   : > { %s178_s9 = ssub.s32 %s1800_s27, %s1882_s30  ;;  %p191_p0 = scmp.ne.s32.totalorder %s1796_s26, %s1792_s25 }
   0x8   : > { %p179_p1 = scmp.eq.s32.totalorder %s178_s9, 0  ;;  %p192_p2 = scmp.eq.s32.totalorder %s1878_s28, 1 }
   0x9   : > { %p197_p3 = scmp.ne.s32.totalorder %s1792_s25, %s1788_s24  ;;  %p198_p4 = scmp.eq.s32.totalorder %s1024_s29, 1 }
   0xa   : > { %s1893_s10 = scalar_select %p179_p1, %s1796_s26, %s181_s8  }
   0xb   : > { %p1895_p5 = por %p192_p2, %p191_p0  ;;  %p1899_p6 = por %p198_p4, %p197_p3 }
   0xc   : > { %2215 = sst [smem:[#allocation11_spill]] %s1893_s10  ;;  %p1025_p7 = scmp.ge.s32.totalorder %s1800_s27, 1 }
   0xd   : > { %s2216_s11 = scalar_select %p1895_p5, 1, 0 }
   0xe   : > { %s2217_s12 = scalar_select %p1899_p6, 1, 0 }
   0xf   : > { %p205_p8 = scmp.lt.s32.totalorder %s1800_s27, 3  ;;  %p2212_p9 = scmp.eq.s32.totalorder %s1878_s28, 0 }
  0x10   : > { %s1802_s14 = smov [#allocation2]   ;;  %s1803_s17 = smov [#allocation5]  }
  0x11   : > { %p1906_p10 = pnand %p1025_p7, %p205_p8  ;;  %s217_s15 = sshll.u32 %s1802_s14, 4  ;;  %s218_s15 = int_to_ptr.vmem [resolvable:$true] %s217_s15 }
  0x12   : > { %s233_s18 = sshll.u32 %s1803_s17, 4  ;;  %s1674_s21 = scalar_lea.hbm %s2205_s1, 2048  ;;  %s1918_s18 = int_to_ptr.vmem [resolvable:$true] %s233_s18 }
  0x13   : > { %s2218_s13 = scalar_select %p1906_p10, 1, 0 }
  0x14   : > { %p1592_p11 = pneg %p1906_p10  ;;  %p1675_p13 = scmp.ne.s32.totalorder %s2205_s1, %s1674_s21 }
  0x15   : > { %p1681_p3 = scmp.lt.u32.totalorder %s1674_s21, %s2205_s1 }
  0x16   : > { %p1914_p12 = pnand %p2212_p9, %p1592_p11 }
  0x18   : > { %p1676_p0 = pneg %p1914_p12 }
  0x1a   : > { %p1677_p1 = pnand %p1676_p0, %p1675_p13 }
  0x1c   : > { %p1678_p2 = pneg %p1677_p1 }
  0x1e   : > { %p1683_p4 = pnand %p1681_p3, %p1678_p2 }
  0x20   : > { %1686 = shalt.err (!%p1683_p4)
}
  0x21   : > { %s1687_s9 = scalar_lea.vmem %s218_s15, 2048  ;;  %p1695_p9 = scmp.lt.s32.totalorder %s218_s15, %s218_s15 }
  0x22   : > { %p1688_p7 = scmp.ne.s32.totalorder %s218_s15, %s1687_s9  ;;  %p1696_p6 = scmp.lt.s32.totalorder %s1687_s9, %s1687_s9 }
  0x24   : > { %p1690_p8 = pnand %p1688_p7, %p1676_p0  ;;  %p1697_p5 = por %p1696_p6, %p1695_p9 }
  0x26   : > { %p1691_p11 = pneg %p1690_p8 }
  0x28   : > { %p1698_p10 = pnand %p1697_p5, %p1691_p11 }
  0x2a   : > { %1701 = shalt.err (!%p1698_p10)
}
  0x2b   : > { %s1804_s14 = smov 128   ;;  %s1805_s17 = smov 8  }
  0x2c   : > { %1595 = dma.hbm_to_vmem [thread:$0]  (!%p1914_p12), %s2205_s1, 2048, %s218_s15, [#allocation3], %s1804_s14, %s1804_s14, %s1805_s17  }
  0x2d   : > { %s1702_s23 = scalar_lea.hbm %s2207_s3, 2048 }
  0x2e   : > { %p1703_p13 = scmp.ne.s32.totalorder %s2207_s3, %s1702_s23  ;;  %p1709_p9 = scmp.lt.u32.totalorder %s1702_s23, %s2207_s3 }
  0x30   : > { %p1705_p5 = pnand %p1703_p13, %p1676_p0 }
  0x32   : > { %p1706_p6 = pneg %p1705_p5 }
  0x34   : > { %p1711_p10 = pnand %p1709_p9, %p1706_p6 }
  0x36   : > { %1714 = shalt.err (!%p1711_p10)
}
  0x37   : > { %s1715_s15 = scalar_lea.vmem %s1918_s18, 2048  ;;  %p1723_p4 = scmp.lt.s32.totalorder %s1918_s18, %s1918_s18 }
  0x38   : > { %p1716_p1 = scmp.ne.s32.totalorder %s1918_s18, %s1715_s15  ;;  %p1724_p7 = scmp.lt.s32.totalorder %s1715_s15, %s1715_s15 }
  0x3a   : > { %p1718_p2 = pnand %p1716_p1, %p1676_p0  ;;  %p1725_p8 = por %p1724_p7, %p1723_p4 }
  0x3c   : > { %p1719_p3 = pneg %p1718_p2 }
  0x3e   : > { %p1726_p11 = pnand %p1725_p8, %p1719_p3 }
  0x40   : > { %1729 = shalt.err (!%p1726_p11)
}
  0x41   : > { %1598 = dma.hbm_to_vmem [thread:$0]  (!%p1914_p12), %s2207_s3, 2048, %s1918_s18, [#allocation6], %s1804_s14, %s1804_s14, %s1805_s17  }
  0x42   : > { %p2220_p13 = scmp.ne.s32.totalorder %s2218_s13, 0 }
  0x43   : > { %p2221_p5 = scmp.eq.s32.totalorder (!%p2220_p13), %s1878_s28, 0 }
  0x44   : > { %265 = sbr.rel (%p2220_p13) target bundleno = 2125 (0x84d), region = 48 }
  0x4b   : > { %1775 = dma.done.wait (%p2221_p5), [#allocation3], 2048   ;;  %p2222_p0 = pmov %p2221_p5 }
  0x4d   : > { %1777 = vsyncadd (%p2222_p0), [#allocation3], 4294965248  ;;  %p2223_p6 = pmov %p2222_p0 }
  0x4e   : > { %p2224_p9 = pmov %p2222_p0 }
  0x4f   : > { %1779 = dma.done.wait (%p2223_p6), [#allocation6], 2048  }
  0x50   : > { %1781 = vsyncadd (%p2224_p9), [#allocation6], 4294965248  ;;  %p300_p10 = scmp.lt.s32.totalorder %s1878_s28, 1  ;;  %v1806_v0 = vmov 0   ;;  %v1807_v1 = vmov 0.0|0.0   ;;  %v311_v3 = vld [vmem:[#allocation2] sm:$0xff]  ;;  %v328_v33 = vlaneseq }
  0x51   : > { %1654 = vset.pattern.permute.xlu0 %v1806_v0  ;;  %1414 = vmatprep.subr.bf16.mxu0 %v1807_v1  ;;  %v312_v4 = vld [vmem:[#allocation2 + $0x8] sm:$0xff]  ;;  %v313_v7 = vld [vmem:[#allocation2 + $0x10] sm:$0xff]  ;;  %v314_v8 = vld [vmem:[#allocation2 + $0x18] sm:$0xff]  ;;  %vm1808_vm2 = vmmov 0   ;;  %v1809_v18 = vmov 0.0   ;;  %v1810_v22 = vmov 1  }
  0x52   : > { %s301_s13 = scalar_select %p300_p10, %s1878_s28, 1  ;;  %1438 = vmatprep.subr.bf16.mxu1 %v1807_v1  ;;  %v1984_v6 = vpack.c.bf16 %v312_v4, %v311_v3  ;;  %v1987_v9 = vpack.c.bf16 %v314_v8, %v313_v7  ;;  %v315_v11 = vld [vmem:[#allocation2 + $0x20] sm:$0xff]  ;;  %v316_v12 = vld [vmem:[#allocation2 + $0x28] sm:$0xff]  ;;  %v317_v16 = vld [vmem:[#allocation2 + $0x30] sm:$0xff]  ;;  %1201 = vmatprep.mubr.msk.f32.mxu0 %vm1808_vm2, %v1809_v18  ;;  %v2040_v34 = vand.u32 127, %v328_v33  ;;  %v1811_v36 = vmov 1.0  }
  0x53   : > { %v1995_v15 = vpack.c.bf16 %v316_v12, %v315_v11  ;;  %v318_v17 = vld [vmem:[#allocation2 + $0x38] sm:$0xff]  ;;  %1236 = vmatprep.mubr.msk.f32.mxu1 %vm1808_vm2, %v1809_v18  ;;  %v319_v20 = vld [vmem:[#allocation2 + $0x40] sm:$0xff]  ;;  %v320_v21 = vld [vmem:[#allocation2 + $0x48] sm:$0xff]  ;;  %v1812_v37 = vmov 2   ;;  %v1813_v46 = vmov 3   ;;  %v1814_v54 = vmov 4  }
  0x54   : > { %s1033_s16 = sshll.u32 %s301_s13, 3  ;;  %1416 = vmatpush3.bf16.msra.mxu0 %v1984_v6  ;;  %1440 = vmatpush3.bf16.msra.mxu1 %v1984_v6  ;;  %v2006_v19 = vpack.c.bf16 %v318_v17, %v317_v16  ;;  %v2013_v23 = vpack.c.bf16 %v320_v21, %v319_v20  ;;  %v321_v24 = vld [vmem:[#allocation2 + $0x50] sm:$0xff]  ;;  %v322_v25 = vld [vmem:[#allocation2 + $0x58] sm:$0xff]  ;;  %v323_v27 = vld [vmem:[#allocation2 + $0x60] sm:$0xff]  ;;  %v1815_v62 = vmov 5   ;;  %vm897_vm9 = vcmask 261120  }
  0x55   : > { %s303_s17 = scalar_lea.vmem %s2204_s0, %s1033_s16  ;;  %1417 = vmatprep.subr.bf16.mxu0 %v1807_v1  ;;  %1441 = vmatprep.subr.bf16.mxu1 %v1807_v1  ;;  %v2019_v26 = vpack.c.bf16 %v322_v25, %v321_v24  ;;  %v324_v28 = vld [vmem:[#allocation2 + $0x68] sm:$0xff]  ;;  %v325_v30 = vld [vmem:[#allocation2 + $0x70] sm:$0xff]  ;;  %v326_v31 = vld [vmem:[#allocation2 + $0x78] sm:$0xff]  ;;  %s297_s29 = sand.u32 1, %s1792_s25  }
  0x56   : > { %v304_v2 = vld [vmem:[%s303_s17] sm:$0xff]  ;;  %v2025_v29 = vpack.c.bf16 %v324_v28, %v323_v27  ;;  %v2031_v32 = vpack.c.bf16 %v326_v31, %v325_v30  ;;  %1656 = vset.pattern.permute.xlu1 %v1812_v37  ;;  %v805_v8 = vld [vmem:[#allocation5 + $0x8] sm:$0xff]  ;;  %v807_v11 = vld [vmem:[#allocation5 + $0x18] sm:$0xff]  ;;  %s1032_s8 = sshll.u32 %s297_s29, 3  ;;  %s1047_s13 = sshll.u32 %s1878_s28, 7 }
  0x57   : > { %v1034_v5 = vadd.s32 8, %v304_v2  ;;  %v2065_v38 = vld [vmem:[%s2206_s2] ss:$0 sm:$0xff]  ;;  %v810_v16 = vld [vmem:[#allocation5 + $0x30] sm:$0xff]  ;;  %v811_v17 = vld [vmem:[#allocation5 + $0x38] sm:$0xff]  ;;  %s299_s16 = scalar_lea.vmem [#allocation7], %s1032_s8  ;;  %s2162_s20 = scalar_lea.hbm %s2211_s7, %s1047_s13 }
  0x58   : > { %1419 = vmatpush3.bf16.msra.mxu0 %v1987_v9  ;;  %1443 = vmatpush3.bf16.msra.mxu1 %v1987_v9  ;;  %v804_v7 = vld [vmem:[#allocation5] sm:$0xff]  ;;  %v813_v21 = vld [vmem:[#allocation5 + $0x48] sm:$0xff]  ;;  %v814_v30 = vld [vmem:[#allocation5 + $0x50] sm:$0xff]  ;;  %s943_s18 = sshll.u32 %s299_s16, 4  ;;  %s930_s21 = scalar_lea.sflag [#allocation4], %s297_s29  ;;  %s2164_s18 = int_to_ptr.vmem [resolvable:$true] %s943_s18 }
  0x59   : > { %vm306_vm0 = vcmp.gt.s32.totalorder %v1034_v5, 0  ;;  %1420 = vmatprep.subr.bf16.mxu0 %v1807_v1  ;;  %1444 = vmatprep.subr.bf16.mxu1 %v1807_v1  ;;  %v812_v20 = vld [vmem:[#allocation5 + $0x40] sm:$0xff]  ;;  %v815_v31 = vld [vmem:[#allocation5 + $0x58] sm:$0xff]  ;;  %v818_v37 = vld [vmem:[#allocation5 + $0x70] sm:$0xff]  ;;  %s1730_s22 = scalar_lea.vmem %s2164_s18, 128  ;;  %p2225_p1 = scmp.ne.s32.totalorder %s2216_s11, 0 }
  0x5a   : > { %v307_v10 = vsel %vm306_vm0, %v1034_v5, 0  ;;  %v816_v33 = vld [vmem:[#allocation5 + $0x60] sm:$0xff]  ;;  %p1731_p12 = scmp.ne.s32.totalorder %s2164_s18, %s1730_s22  ;;  %s1816_s28 = smov [#allocation7]  }
  0x5b   : > { %vm308_vm1 = vcmp.lt.s32.totalorder %v307_v10, 16  ;;  %s1734_s23 = sshll.u32 %s1816_s28, 4  ;;  %s1735_s23 = int_to_ptr.vmem [resolvable:$false] %s1734_s23 }
  0x5c   : > { %v309_v13 = vsel %vm308_vm1, %v307_v10, 16  ;;  %1422 = vmatpush3.bf16.msra.mxu0 %v1995_v15  ;;  %1446 = vmatpush3.bf16.msra.mxu1 %v1995_v15  ;;  %v1559_v10 = vpack.c.bf16 %v805_v8, %v804_v7  ;;  %p1732_p2 = pnand %p1731_p12, %p2225_p1  ;;  %s1736_s8 = scalar_lea.vmem %s1735_s23, 256 }
  0x5d   : > { %v1992_v14 = vadd.s32 64, %v309_v13  ;;  %1423 = vmatprep.subr.bf16.mxu0 %v1807_v1  ;;  %1447 = vmatprep.subr.bf16.mxu1 %v1807_v1  ;;  %v808_v13 = vld [vmem:[#allocation5 + $0x20] sm:$0xff]  ;;  %p1737_p4 = scmp.lt.s32.totalorder %s2164_s18, %s1735_s23  ;;  %p1738_p7 = scmp.lt.s32.totalorder %s1736_s8, %s1730_s22 }
  0x5e   : > { %p1733_p3 = pneg %p1732_p2 }
  0x5f   : > { %331 = vperm.xlu0 %1654, %v1992_v14   ;;  %493 = vperm.xlu1 %1656, %v1992_v14   ;;  %p1739_p8 = por %p1738_p7, %p1737_p4 }
  0x60   : > { %1425 = vmatpush3.bf16.msra.mxu0 %v2006_v19  ;;  %1449 = vmatpush3.bf16.msra.mxu1 %v2006_v19 }
  0x61   : > { %1426 = vmatprep.subr.bf16.mxu0 %v1807_v1  ;;  %1450 = vmatprep.subr.bf16.mxu1 %v1807_v1  ;;  %p1740_p11 = pnand %p1739_p8, %p1733_p3 }
  0x63   : > { %1655 = vset.pattern.permute.xlu0 %v1810_v22  ;;  %1657 = vset.pattern.permute.xlu1 %v1813_v46  ;;  %v1571_v22 = vpack.c.bf16 %v813_v21, %v812_v20 }
  0x64   : > { %415 = vperm.xlu0 %1655, %v1992_v14   ;;  %1428 = vmatpush3.bf16.msra.mxu0 %v2013_v23 }
  0x65   : > { %1452 = vmatpush3.bf16.msra.mxu1 %v2013_v23  ;;  %1429 = vmatprep.subr.bf16.mxu0 %v1807_v1 }
  0x66   : > { %1453 = vmatprep.subr.bf16.mxu1 %v1807_v1  ;;  %571 = vperm.xlu1 %1657, %v1992_v14  }
  0x68   : > { %1431 = vmatpush3.bf16.msra.mxu0 %v2019_v26  ;;  %1659 = vset.pattern.permute.xlu0 %v1815_v62 }
  0x69   : > { %1455 = vmatpush3.bf16.msra.mxu1 %v2019_v26  ;;  %1432 = vmatprep.subr.bf16.mxu0 %v1807_v1 }
  0x6a   : > { %1456 = vmatprep.subr.bf16.mxu1 %v1807_v1  ;;  %1658 = vset.pattern.permute.xlu1 %v1814_v54 }
  0x6b   : > { %649 = vperm.xlu1 %1658, %v1992_v14   ;;  %727 = vperm.xlu0 %1659, %v1992_v14   ;;  %v809_v14 = vld [vmem:[#allocation5 + $0x28] sm:$0xff] }
  0x6c   : > { %1434 = vmatpush3.bf16.msra.mxu0 %v2025_v29 }
  0x6d   : > { %1458 = vmatpush3.bf16.msra.mxu1 %v2025_v29  ;;  %1435 = vmatprep.subr.bf16.mxu0 %v1807_v1 }
  0x6e   : > { %1459 = vmatprep.subr.bf16.mxu1 %v1807_v1 }
  0x70   : > { %1437 = vmatpush3.bf16.msra.mxu0 %v2031_v32 }
  0x71   : > { %1461 = vmatpush3.bf16.msra.mxu1 %v2031_v32  ;;  %1462 = vmatprep.subr.bf16.mxu0 %v1807_v1 }
  0x72   : > { %1486 = vmatprep.subr.bf16.mxu1 %v1807_v1 }
  0xde   : > { %v332_v35 = vpop.permute.xlu0 %331  ;;  %v494_v50 = vpop.permute.xlu1 %493 }
  0xdf   : > { %vm333_vm3 = vcmp.eq.s32.totalorder %v2040_v34, %v332_v35  ;;  %vm495_vm5 = vcmp.eq.s32.totalorder %v2040_v34, %v494_v50  ;;  %v817_v35 = vld [vmem:[#allocation5 + $0x68] sm:$0xff] }
  0xe0   : > { %1202 = vmatmul.mubr.msk.f32.vlgmr.msra.gmra.mrb[0].mxu0 %vm333_vm3, %v1811_v36  ;;  %v1039_v51 = vsel %vm495_vm5, 1.0, %v1809_v18  ;;  %v1577_v36 = vpack.c.bf16 %v817_v35, %v816_v33 }
  0xe1   : > { %1464 = vmatpush3.bf16.msra.mxu0 %v1984_v6  ;;  %1271 = vmatprep.mubr.msk.f32.mxu0 %vm1808_vm2, %v1809_v18 }
  0xe2   : > { %1465 = vmatprep.subr.bf16.mxu0 %v1807_v1 }
  0xe3   : > { %v416_v42 = vpop.permute.xlu0 %415 }
  0xe4   : > { %vm417_vm4 = vcmp.eq.s32.totalorder %v2040_v34, %v416_v42 }
  0xe5   : > { %1467 = vmatpush3.bf16.msra.mxu0 %v1987_v9  ;;  %v1038_v43 = vsel %vm417_vm4, 1.0, %v1809_v18  ;;  %v572_v58 = vpop.permute.xlu1 %571 }
  0xe6   : > { %1468 = vmatprep.subr.bf16.mxu0 %v1807_v1  ;;  %vm573_vm6 = vcmp.eq.s32.totalorder %v2040_v34, %v572_v58 }
  0xe7   : > { %v1040_v59 = vsel %vm573_vm6, 1.0, %v1809_v18 }
  0xe9   : > { %1470 = vmatpush3.bf16.msra.mxu0 %v1995_v15 }
  0xea   : > { %1471 = vmatprep.subr.bf16.mxu0 %v1807_v1  ;;  %v650_v3 = vpop.permute.xlu1 %649 }
  0xeb   : > { %vm651_vm7 = vcmp.eq.s32.totalorder %v2040_v34, %v650_v3 }
  0xec   : > { %v1041_v4 = vsel %vm651_vm7, 1.0, %v1809_v18 }
  0xed   : > { %1473 = vmatpush3.bf16.msra.mxu0 %v2006_v19 }
  0xee   : > { %1474 = vmatprep.subr.bf16.mxu0 %v1807_v1 }
  0xf1   : > { %1476 = vmatpush3.bf16.msra.mxu0 %v2013_v23 }
  0xf2   : > { %1477 = vmatprep.subr.bf16.mxu0 %v1807_v1 }
  0xf5   : > { %1479 = vmatpush3.bf16.msra.mxu0 %v2019_v26 }
  0xf6   : > { %1480 = vmatprep.subr.bf16.mxu0 %v1807_v1 }
  0xf9   : > { %1482 = vmatpush3.bf16.msra.mxu0 %v2025_v29 }
  0xfa   : > { %1483 = vmatprep.subr.bf16.mxu0 %v1807_v1 }
  0xfd   : > { %1485 = vmatpush3.bf16.msra.mxu0 %v2031_v32 }
  0xfe   : > { %1510 = vmatprep.subr.bf16.mxu0 %v1807_v1 }
 0x1b3   : > { %v409_v39 = vpop.f32.mrb[0].mxu0 }
 0x1b4   : > { %v410_v40 = vadd.f32 %v2065_v38, %v409_v39  ;;  %v1203_v41 = vpop.f32.mrb[1].mxu0  ;;  %v819_v39 = vld [vmem:[#allocation5 + $0x78] sm:$0xff] }
 0x1b6   : > { %1660 = vtanh.f32 %v410_v40  ;;  %v1580_v40 = vpack.c.bf16 %v819_v39, %v818_v37 }
 0x1c0   : > { %v1661_v44 = vpop.eup %1660 }
 0x1c1   : > { %v420_v45 = vadd.f32 %v1661_v44, %v1038_v43  ;;  %v1043_v43 = vld [vmem:[%s2208_s4] ss:$0 sm:$0xff] }
 0x1c3   : > { %1237 = vmatmul.mubr.f32.vlgmr.msra.gmra.mrb[0].mxu1 %v420_v45 }
 0x1c4   : > { %1488 = vmatpush3.bf16.msra.mxu1 %v1984_v6  ;;  %1306 = vmatprep.mubr.msk.f32.mxu1 %vm1808_vm2, %v1809_v18 }
 0x1c5   : > { %1489 = vmatprep.subr.bf16.mxu1 %v1807_v1 }
 0x1c8   : > { %1491 = vmatpush3.bf16.msra.mxu1 %v1987_v9 }
 0x1c9   : > { %1492 = vmatprep.subr.bf16.mxu1 %v1807_v1 }
 0x1cc   : > { %1494 = vmatpush3.bf16.msra.mxu1 %v1995_v15 }
 0x1cd   : > { %1495 = vmatprep.subr.bf16.mxu1 %v1807_v1 }
 0x1d0   : > { %1497 = vmatpush3.bf16.msra.mxu1 %v2006_v19 }
 0x1d1   : > { %1498 = vmatprep.subr.bf16.mxu1 %v1807_v1 }
 0x1d4   : > { %1500 = vmatpush3.bf16.msra.mxu1 %v2013_v23 }
 0x1d5   : > { %1501 = vmatprep.subr.bf16.mxu1 %v1807_v1 }
 0x1d8   : > { %1503 = vmatpush3.bf16.msra.mxu1 %v2019_v26 }
 0x1d9   : > { %1504 = vmatprep.subr.bf16.mxu1 %v1807_v1 }
 0x1dc   : > { %1506 = vmatpush3.bf16.msra.mxu1 %v2025_v29 }
 0x1dd   : > { %1507 = vmatprep.subr.bf16.mxu1 %v1807_v1 }
 0x1e0   : > { %1509 = vmatpush3.bf16.msra.mxu1 %v2031_v32 }
 0x1e1   : > { %1534 = vmatprep.subr.bf16.mxu1 %v1807_v1 }
 0x296   : > { %v487_v47 = vpop.f32.mrb[0].mxu1 }
 0x297   : > { %v488_v48 = vadd.f32 %v2065_v38, %v487_v47  ;;  %v1238_v49 = vpop.f32.mrb[1].mxu1 }
 0x299   : > { %1662 = vtanh.f32 %v488_v48 }
 0x2a3   : > { %v1663_v52 = vpop.eup %1662 }
 0x2a4   : > { %v498_v53 = vadd.f32 %v1663_v52, %v1039_v51 }
 0x2a6   : > { %1272 = vmatmul.mubr.f32.vlgmr.msra.gmra.mrb[2].mxu0 %v498_v53 }
 0x2a7   : > { %1512 = vmatpush3.bf16.msra.mxu0 %v1984_v6  ;;  %1341 = vmatprep.mubr.msk.f32.mxu0 %vm1808_vm2, %v1809_v18 }
 0x2a8   : > { %1513 = vmatprep.subr.bf16.mxu0 %v1807_v1 }
 0x2ab   : > { %1515 = vmatpush3.bf16.msra.mxu0 %v1987_v9 }
 0x2ac   : > { %1516 = vmatprep.subr.bf16.mxu0 %v1807_v1 }
 0x2af   : > { %1518 = vmatpush3.bf16.msra.mxu0 %v1995_v15 }
 0x2b0   : > { %1519 = vmatprep.subr.bf16.mxu0 %v1807_v1 }
 0x2b3   : > { %1521 = vmatpush3.bf16.msra.mxu0 %v2006_v19 }
 0x2b4   : > { %1522 = vmatprep.subr.bf16.mxu0 %v1807_v1 }
 0x2b7   : > { %1524 = vmatpush3.bf16.msra.mxu0 %v2013_v23 }
 0x2b8   : > { %1525 = vmatprep.subr.bf16.mxu0 %v1807_v1 }
 0x2bb   : > { %1527 = vmatpush3.bf16.msra.mxu0 %v2019_v26 }
 0x2bc   : > { %1528 = vmatprep.subr.bf16.mxu0 %v1807_v1 }
 0x2bf   : > { %1530 = vmatpush3.bf16.msra.mxu0 %v2025_v29 }
 0x2c0   : > { %1531 = vmatprep.subr.bf16.mxu0 %v1807_v1 }
 0x2c3   : > { %1533 = vmatpush3.bf16.msra.mxu0 %v2031_v32 }
 0x2c4   : > { %1558 = vmatprep.subr.bf16.mxu0 %v1807_v1 }
 0x379   : > { %v565_v55 = vpop.f32.mrb[2].mxu0 }
 0x37a   : > { %v566_v56 = vadd.f32 %v2065_v38, %v565_v55  ;;  %v1273_v57 = vpop.f32.mrb[3].mxu0  ;;  %v1044_v55 = vld [vmem:[%s2209_s5] ss:$0 sm:$0xff] }
 0x37b   : > { %v1045_v57 = vld [vmem:[%s2210_s6] ss:$0 sm:$0xff] }
 0x37c   : > { %1664 = vtanh.f32 %v566_v56 }
 0x386   : > { %v1665_v60 = vpop.eup %1664 }
 0x387   : > { %v576_v61 = vadd.f32 %v1665_v60, %v1040_v59 }
 0x389   : > { %1307 = vmatmul.mubr.f32.vlgmr.msra.gmra.mrb[2].mxu1 %v576_v61 }
 0x38a   : > { %1536 = vmatpush3.bf16.msra.mxu1 %v1984_v6  ;;  %1376 = vmatprep.mubr.msk.f32.mxu1 %vm1808_vm2, %v1809_v18 }
 0x38b   : > { %1537 = vmatprep.subr.bf16.mxu1 %v1807_v1 }
 0x38e   : > { %1539 = vmatpush3.bf16.msra.mxu1 %v1987_v9  ;;  %v806_v9 = vld [vmem:[#allocation5 + $0x10] sm:$0xff] }
 0x38f   : > { %1540 = vmatprep.subr.bf16.mxu1 %v1807_v1  ;;  %v1562_v12 = vpack.c.bf16 %v807_v11, %v806_v9 }
 0x392   : > { %1542 = vmatpush3.bf16.msra.mxu1 %v1995_v15  ;;  %v1565_v15 = vpack.c.bf16 %v809_v14, %v808_v13 }
 0x393   : > { %1543 = vmatprep.subr.bf16.mxu1 %v1807_v1 }
 0x396   : > { %1545 = vmatpush3.bf16.msra.mxu1 %v2006_v19  ;;  %v1568_v19 = vpack.c.bf16 %v811_v17, %v810_v16 }
 0x397   : > { %1546 = vmatprep.subr.bf16.mxu1 %v1807_v1 }
 0x39a   : > { %1548 = vmatpush3.bf16.msra.mxu1 %v2013_v23 }
 0x39b   : > { %1549 = vmatprep.subr.bf16.mxu1 %v1807_v1 }
 0x39e   : > { %1551 = vmatpush3.bf16.msra.mxu1 %v2019_v26  ;;  %v728_v26 = vpop.permute.xlu0 %727 }
 0x39f   : > { %1552 = vmatprep.subr.bf16.mxu1 %v1807_v1  ;;  %vm729_vm8 = vcmp.eq.s32.totalorder %v2040_v34, %v728_v26 }
 0x3a0   : > { %v1042_v27 = vsel %vm729_vm8, 1.0, %v1809_v18 }
 0x3a2   : > { %1554 = vmatpush3.bf16.msra.mxu1 %v2025_v29 }
 0x3a3   : > { %1555 = vmatprep.subr.bf16.mxu1 %v1807_v1 }
 0x3a6   : > { %1557 = vmatpush3.bf16.msra.mxu1 %v2031_v32  ;;  %v1574_v32 = vpack.c.bf16 %v815_v31, %v814_v30 }
 0x45c   : > { %v643_v63 = vpop.f32.mrb[2].mxu1 }
 0x45d   : > { %v644_v0 = vadd.f32 %v2065_v38, %v643_v63  ;;  %v1308_v2 = vpop.f32.mrb[3].mxu1 }
 0x45f   : > { %1666 = vtanh.f32 %v644_v0 }
 0x469   : > { %v1667_v5 = vpop.eup %1666 }
 0x46a   : > { %v654_v6 = vadd.f32 %v1667_v5, %v1041_v4 }
 0x46c   : > { %1342 = vmatmul.mubr.f32.vlgmr.msra.gmra.mrb[4].mxu0 %v654_v6 }
 0x46d   : > { %1411 = vmatprep.mubr.msk.f32.mxu0 %vm1808_vm2, %v1809_v18  ;;  %1560 = vmatpush3.bf16.msra.mxu0 %v1559_v10 }
 0x46e   : > { %1561 = vmatprep.subr.bf16.mxu0 %v1807_v1 }
 0x471   : > { %1563 = vmatpush3.bf16.msra.mxu0 %v1562_v12 }
 0x472   : > { %1564 = vmatprep.subr.bf16.mxu0 %v1807_v1 }
 0x475   : > { %1566 = vmatpush3.bf16.msra.mxu0 %v1565_v15 }
 0x476   : > { %1567 = vmatprep.subr.bf16.mxu0 %v1807_v1 }
 0x479   : > { %1569 = vmatpush3.bf16.msra.mxu0 %v1568_v19 }
 0x47a   : > { %1570 = vmatprep.subr.bf16.mxu0 %v1807_v1 }
 0x47d   : > { %1572 = vmatpush3.bf16.msra.mxu0 %v1571_v22 }
 0x47e   : > { %1573 = vmatprep.subr.bf16.mxu0 %v1807_v1 }
 0x481   : > { %1575 = vmatpush3.bf16.msra.mxu0 %v1574_v32 }
 0x482   : > { %1576 = vmatprep.subr.bf16.mxu0 %v1807_v1 }
 0x485   : > { %1578 = vmatpush3.bf16.msra.mxu0 %v1577_v36 }
 0x486   : > { %1579 = vmatprep.subr.bf16.mxu0 %v1807_v1 }
 0x489   : > { %1581 = vmatpush3.bf16.msra.mxu0 %v1580_v40 }
 0x53f   : > { %v721_v23 = vpop.f32.mrb[4].mxu0 }
 0x540   : > { %v722_v24 = vadd.f32 %v2065_v38, %v721_v23  ;;  %v1343_v25 = vpop.f32.mrb[5].mxu0 }
 0x542   : > { %1668 = vtanh.f32 %v722_v24 }
 0x54c   : > { %v1669_v28 = vpop.eup %1668 }
 0x54d   : > { %v732_v29 = vadd.f32 %v1669_v28, %v1042_v27 }
 0x54f   : > { %1377 = vmatmul.mubr.f32.vlgmr.msra.gmra.mrb[4].mxu1 %v732_v29 }
 0x622   : > { %v799_v18 = vpop.f32.mrb[4].mxu1 }
 0x623   : > { %v800_v34 = vadd.f32 %v2065_v38, %v799_v18  ;;  %v1378_v41 = vpop.f32.mrb[5].mxu1 }
 0x625   : > { %1670 = vtanh.f32 %v800_v34 }
 0x62f   : > { %v1671_v42 = vpop.eup %1670 }
 0x630   : > { %1412 = vmatmul.mubr.f32.vlgmr.msra.gmra.mrb[6].mxu0 %v1671_v42 }
 0x703   : > { %v893_v44 = vpop.f32.mrb[6].mxu0 }
 0x704   : > { %v894_v45 = vadd.f32 %v1043_v43, %v893_v44  ;;  %v1413_v46 = vpop.f32.mrb[7].mxu0 }
 0x706   : > { %v898_v47 = vsel %vm897_vm9, %v894_v45, 0.0 }
 0x707   : > { %899 = vadd.xlane.f32.xlu1 %v898_v47 }
 0x794   : > { %v900_v1 = vpop.xlane.xlu1 %899 }
 0x795   : > { %v902_v48 = vmul.f32 0.03125, %v900_v1 }
 0x797   : > { %v903_v49 = vsub.f32 %v894_v45, %v902_v48 }
 0x799   : > { %v904_v38 = vmul.f32 %v903_v49, %v903_v49 }
 0x79b   : > { %v905_v50 = vsel %vm897_vm9, %v904_v38, 0.0 }
 0x79c   : > { %906 = vadd.xlane.f32.xlu0 %v905_v50 }
 0x829   : > { %v907_v51 = vpop.xlane.xlu0 %906 }
 0x82a   : > { %v908_v52 = vmul.f32 0.03125, %v907_v51 }
 0x82c   : > { %v909_v53 = vadd.f32 1e-05, %v908_v52 }
 0x82e   : > { %1672 = vrsqrt.f32 %v909_v53 }
 0x838   : > { %v1673_v54 = vpop.eup %1672 }
 0x839   : > { %v911_v56 = vmul.f32 %v1673_v54, %v903_v49 }
 0x83b   : > { %v919_v58 = vmul.f32 %v1044_v55, %v911_v56 }
 0x83d   : > { %v927_v59 = vadd.f32 %v1045_v57, %v919_v58 }
 0x83f   : > { %928 = vst [vmem:[%s299_s16] sm:$0xff] %v927_v59 }
 0x840   : > { %1743 = shalt.err (!%p1740_p11)
}
 0x841   : > { %s1744_s29 = scalar_lea.hbm %s2162_s20, 128  ;;  %s1748_s10 = scalar_lea.hbm %s2211_s7, 256 }
 0x842   : > { %p1745_p13 = scmp.ne.s32.totalorder %s2162_s20, %s1744_s29  ;;  %p1749_p6 = scmp.lt.u32.totalorder %s2162_s20, %s2211_s7 }
 0x843   : > { %p1750_p9 = scmp.lt.u32.totalorder %s1748_s10, %s1744_s29  ;;  %p1752_p12 = scmp.lt.u32.totalorder %s1744_s29, %s2162_s20 }
 0x844   : > { %p1746_p5 = pnand %p1745_p13, %p2225_p1 }
 0x845   : > { %p1751_p10 = por %p1750_p9, %p1749_p6 }
 0x846   : > { %p1747_p0 = pneg %p1746_p5 }
 0x847   : > { %p1753_p2 = por %p1752_p12, %p1751_p10 }
 0x849   : > { %p1754_p3 = pnand %p1753_p2, %p1747_p0 }
 0x84b   : > { %1757 = shalt.err (!%p1754_p3)
}
 0x84c   : > { %1590 = dma.vmem_to_hbm [thread:$0]  (%p2225_p1), %s2164_s18, 128, %s2162_s20, %s930_s21  }
 0x84d PF: > { %p1607_p4 = scmp.ge.s32.totalorder %s1800_s27, 2  ;;  %s955_s16 = sand.u32 1, %s1788_s24  }
 0x84e   : > { %p2226_p7 = scmp.ne.s32.totalorder %s2217_s12, 0  ;;  %s956_s14 = scalar_lea.sflag [#allocation4], %s955_s16 }
 0x850   : > { %p1600_p8 = pnand %p1607_p4, %p2226_p7 }
 0x852   : > { %1783 = dma.done.wait (!%p1600_p8), %s956_s14, 128  }
 0x853   : > { %1785 = vsyncadd (!%p1600_p8), %s956_s14, 4294967168  ;;  %s2227_s17 = sld [smem:[#allocation11_spill]]  ;;  %p19_p11 = scmp.ge.s32.totalorder %s1882_s30, 4  }
 0x854   : > { %s2228_s24 = smov %s1792_s25  ;;  %s2229_s25 = smov %s1796_s26 }
 0x855   : > { %s2231_s27 = smov %s1882_s30  ;;  %21 = sbr.rel (!%p19_p11) target bundleno = 5 (0x5), region = 92 }
 0x859   : > { %s2230_s26 = smov %s2227_s17 }
 0x85c   :  { %961 = vsyncpa [#allocation3], 1 }
 0x85d   :  { %963 = vsyncpa [#allocation3 + $0x1], 1 }
 0x85e   :  { %964 = vsyncpa [#allocation6], 1 }
 0x85f   :  { %965 = vsyncpa [#allocation4], 1 }
 0x860   :  { %967 = vsyncpa [#allocation4 + $0x1], 1 }

</bundles_post_ra>
